<compile_context>
chip_gen: v5e
topology: v5e:2x2
jax: 0.10.0
libtpu: 0.0.40
codegen_flags: <defaults>
</compile_context>

<pallas_src>
import jax
import jax.numpy as jnp
from jax.experimental import pallas as pl
from jax.experimental.pallas import tpu as pltpu


# -----------------------------------------------------------------------------
# Prologue kernel: mlp2 on the raw per-point features (channels-first),
# applied BEFORE the neighbour gather (1x1 conv commutes with the gather).
# -----------------------------------------------------------------------------
def _mlp2_kernel(feat_ref, w2_ref, b2_ref, out_ref):
    x = feat_ref[0]                                            # (d_in, TN)
    h = jnp.dot(w2_ref[...], x, preferred_element_type=jnp.float32) + b2_ref[...]
    out_ref[0] = jnp.maximum(h, 0.0).astype(out_ref.dtype)     # (dm, TN) dense store


# -----------------------------------------------------------------------------
# Main kernel (one (batch, point-tile) block), points-on-lanes:
#   rel-pos encoding + mlp1 (split w1, hoisted centre term), mlp3, fused
#   fc-score / max-over-K loop, softmax, mlp4, shortcut, residual add.
# -----------------------------------------------------------------------------
def _block_kernel(xyz_ref, nxyz_ref, h2g_ref, feat_ref,
                  w1h_ref, w1n_ref, w1d_ref, b1_ref,
                  w3a_ref, w3b_ref, b3_ref,
                  fcw_ref, fcb_ref,
                  w4_ref, b4_ref,
                  ws_ref, bs_ref,
                  out_ref):
    K = nxyz_ref.shape[1]

    xyz_c = xyz_ref[0]                                         # (3, TN) centre points
    # K-invariant part of mlp1, hoisted out of the K loop:
    #   h1_k = relu( (w_tile + w_rel)@xyz_c + (w_nxyz - w_rel)@nxyz_k
    #                + w_dist * dist_k + b1 )
    h1_c = (jnp.dot(w1h_ref[...], xyz_c, preferred_element_type=jnp.float32)
            + b1_ref[...])                                     # (dm, TN)

    f_max = None
    score = None
    for k in range(K):                                         # unrolled; K is small
        nxyz_k = nxyz_ref[0, k]                                # (3, TN)
        h2_k = h2g_ref[0, k]                                   # (dm, TN)

        rel = xyz_c - nxyz_k                                   # (3, TN)
        dist = jnp.sqrt(jnp.sum(rel * rel, axis=0, keepdims=True))   # (1, TN)

        h1_k = (h1_c
                + jnp.dot(w1n_ref[...], nxyz_k, preferred_element_type=jnp.float32)
                + w1d_ref[...] * dist)
        h1_k = jnp.maximum(h1_k, 0.0)                          # mlp1

        h3_k = (jnp.dot(w3a_ref[...], h2_k, preferred_element_type=jnp.float32)
                + jnp.dot(w3b_ref[...], h1_k, preferred_element_type=jnp.float32)
                + b3_ref[...])
        h3_k = jnp.maximum(h3_k, 0.0)                          # mlp3, (dm, TN)

        w_k = fcw_ref[k]                                       # (dm, 1) fc weight for k
        if k == 0:
            score = w_k * h3_k
            f_max = h3_k
        else:
            score = score + w_k * h3_k
            f_max = jnp.maximum(f_max, h3_k)

    # attention score: nn.Linear(k_n, 1) over neighbours, softmax over channels
    score = score + fcb_ref[...]                               # (dm, TN)
    m = jnp.max(score, axis=0, keepdims=True)
    e = jnp.exp(score - m)
    s = jnp.sum(e, axis=0, keepdims=True)
    att = e * pl.reciprocal(s, approx=True)                    # divide on the EUP

    f_agg = f_max * (1.0 + att)                                # f_max + f_max*score

    h4 = jnp.dot(w4_ref[...], f_agg, preferred_element_type=jnp.float32) + b4_ref[...]
    h4 = jnp.maximum(h4, 0.0)                                  # mlp4, (d_out, TN)

    sc = jnp.dot(ws_ref[...], feat_ref[0], preferred_element_type=jnp.float32) + bs_ref[...]
    sc = jnp.maximum(sc, 0.0)                                  # shortcut, (d_out, TN)

    out_ref[0] = (h4 + sc).astype(out_ref.dtype)               # lane-dense store


# -----------------------------------------------------------------------------
# Plain-JAX glue: the only data-dependent step left outside the kernels.
# -----------------------------------------------------------------------------
def _gather_neighbour_cf(src_cf, idx_t):
    # src_cf: (B, C, N); idx_t: (B, K, N) -> (B, K, C, N)
    # out[b, k, c, n] = src_cf[b, c, idx_t[b, k, n]]
    return jnp.take_along_axis(src_cf[:, None, :, :], idx_t[:, :, None, :], axis=3)


def _pick_tile(n_pad):
    """Point tile (multiple of 128). Prefer large lane-dense tiles for DMA /
    pipeline efficiency, but keep >= 2 tiles so both v7x TensorCores get work
    even at batch 1."""
    for tn in (1024, 512, 256, 128):
        if n_pad % tn == 0 and n_pad // tn >= 2:
            return tn
    return min(n_pad, 128)


# -----------------------------------------------------------------------------
# Parameter init (deterministic, synthetic). BatchNorm (eval mode) kept as
# per-channel scale/bias; the wrapper folds scale into the weights.
# -----------------------------------------------------------------------------
def init_params(key, d_in, d_out, m, k_n):
    dm = d_out // m

    def conv_bn(k, cin, cout):
        k1, k2, k3, k4, k5 = jax.random.split(k, 5)
        w = jax.random.normal(k1, (cin, cout), jnp.float32) * 0.1
        gamma = jax.random.uniform(k2, (cout,), jnp.float32, 0.5, 1.5)
        beta = jax.random.normal(k3, (cout,), jnp.float32) * 0.1
        mean = jax.random.normal(k4, (cout,), jnp.float32) * 0.1
        var = jax.random.uniform(k5, (cout,), jnp.float32, 0.5, 1.5)
        scale = gamma / jnp.sqrt(var + 1e-5)
        bias = beta - mean * scale
        return w, scale.reshape(1, cout), bias.reshape(1, cout)

    ks = jax.random.split(key, 7)
    p = {}
    p['w1'], p['s1'], p['b1'] = conv_bn(ks[0], 10, dm)
    p['w2'], p['s2'], p['b2'] = conv_bn(ks[1], d_in, dm)
    w3, p['s3'], p['b3'] = conv_bn(ks[2], 2 * dm, dm)
    p['w3a'], p['w3b'] = w3[:dm], w3[dm:]
    p['fcw'] = jax.random.normal(ks[3], (1, k_n), jnp.float32) * 0.1
    p['fcb'] = jnp.full((1, 1), 0.01, jnp.float32)
    p['w4'], p['s4'], p['b4'] = conv_bn(ks[4], dm, d_out)
    p['ws'], p['ss'], p['bs'] = conv_bn(ks[5], d_in, d_out)
    return p


# -----------------------------------------------------------------------------
# Wrapper around the two pallas_calls.
# -----------------------------------------------------------------------------
def block_forward(feature_nchw, xyz, neigh_idx, params, *, tile_n=None):
    # feature_nchw: (B, d_in, N, 1)  (PyTorch conv layout)
    B, d_in, N, _ = feature_nchw.shape
    K = neigh_idx.shape[-1]
    dm = params['w1'].shape[1]
    d_out = params['w4'].shape[1]

    # channels-first / points-on-lanes host layout
    feat_cf = feature_nchw[..., 0]                       # (B, d_in, N)
    xyz_cf = jnp.transpose(xyz, (0, 2, 1))               # (B, 3, N)

    # pad points to a multiple of 128 -> every tile / store is lane-dense
    n_pad = ((N + 127) // 128) * 128
    if n_pad != N:
        pw = ((0, 0), (0, 0), (0, n_pad - N))
        feat_cf = jnp.pad(feat_cf, pw)
        xyz_cf = jnp.pad(xyz_cf, pw)
        neigh_idx = jnp.pad(neigh_idx, ((0, 0), (0, n_pad - N), (0, 0)))

    TN = _pick_tile(n_pad) if tile_n is None else tile_n
    assert n_pad % TN == 0 and TN % 128 == 0
    grid = (B, n_pad // TN)
    dsem = pltpu.CompilerParams(dimension_semantics=("parallel", "parallel"))

    # Fold the (eval-mode) BatchNorm scale into the conv weights and move them
    # channels-first:  relu((x @ w) * s + b) == relu((w*s).T @ x_cf + b_cf)
    w1f = params['w1'] * params['s1']                    # (10, dm); rows =
    w1h = jnp.transpose(w1f[1:4] + w1f[4:7])             #  [dist | rel | tile | nxyz]
    w1n = jnp.transpose(w1f[7:10] - w1f[1:4])            # (dm, 3)
    w1d = jnp.transpose(w1f[0:1])                        # (dm, 1)
    b1c = params['b1'].reshape(dm, 1)
    w2c = jnp.transpose(params['w2'] * params['s2'])     # (dm, d_in)
    b2c = params['b2'].reshape(dm, 1)
    w3ac = jnp.transpose(params['w3a'] * params['s3'])   # (dm, dm)
    w3bc = jnp.transpose(params['w3b'] * params['s3'])   # (dm, dm)
    b3c = params['b3'].reshape(dm, 1)
    fcwk = jnp.broadcast_to(params['fcw'].reshape(K, 1, 1), (K, dm, 1))
    fcbc = params['fcb'].reshape(1, 1)
    w4c = jnp.transpose(params['w4'] * params['s4'])     # (d_out, dm)
    b4c = params['b4'].reshape(d_out, 1)
    wsc = jnp.transpose(params['ws'] * params['ss'])     # (d_out, d_in)
    bsc = params['bs'].reshape(d_out, 1)

    def _full_spec(p):
        nd = p.ndim
        return pl.BlockSpec(p.shape, lambda b, t, _nd=nd: (0,) * _nd)

    # ---- prologue: mlp2 BEFORE the gather (1x1 conv commutes with the gather)
    h2_cf = pl.pallas_call(
        _mlp2_kernel,
        out_shape=jax.ShapeDtypeStruct((B, dm, n_pad), jnp.float32),
        grid=grid,
        in_specs=[pl.BlockSpec((1, d_in, TN), lambda b, t: (b, 0, t)),
                  _full_spec(w2c), _full_spec(b2c)],
        out_specs=pl.BlockSpec((1, dm, TN), lambda b, t: (b, 0, t)),
        compiler_params=dsem,
    )(feat_cf, w2c, b2c)

    # ---- glue: gather only 3-channel xyz and dm-wide h2, (B, K, C, N) layout.
    # TODO(synk): move this gather in-kernel (PrefetchScalarGridSpec + manual
    #             DMA row gather) to remove the last K-expanded HBM round-trip.
    idx_t = jnp.transpose(neigh_idx, (0, 2, 1))          # (B, K, n_pad)
    nxyz_g = _gather_neighbour_cf(xyz_cf, idx_t)         # (B, K, 3, n_pad)
    h2_g = _gather_neighbour_cf(h2_cf, idx_t)            # (B, K, dm, n_pad)

    weights = [w1h, w1n, w1d, b1c, w3ac, w3bc, b3c, fcwk, fcbc, w4c, b4c, wsc, bsc]

    in_specs = [
        pl.BlockSpec((1, 3, TN), lambda b, t: (b, 0, t)),
        pl.BlockSpec((1, K, 3, TN), lambda b, t: (b, 0, 0, t)),
        pl.BlockSpec((1, K, dm, TN), lambda b, t: (b, 0, 0, t)),
        pl.BlockSpec((1, d_in, TN), lambda b, t: (b, 0, t)),
    ] + [_full_spec(p) for p in weights]

    out = pl.pallas_call(
        _block_kernel,
        out_shape=jax.ShapeDtypeStruct((B, d_out, n_pad), jnp.float32),
        grid=grid,
        in_specs=in_specs,
        out_specs=pl.BlockSpec((1, d_out, TN), lambda b, t: (b, 0, t)),
        compiler_params=dsem,
    )(xyz_cf, nxyz_g, h2_g, feat_cf, *weights)

    # already NCHW-shaped: strip point padding, add trailing singleton spatial dim
    return out[:, :, :N, None]                           # (B, d_out, N, 1)


# -----------------------------------------------------------------------------
# Pure-JAX reference mirroring the PyTorch forward order exactly.
# -----------------------------------------------------------------------------
def gather_neighbour(pc, neigh_idx):
    # pc: (B, N, d); neigh_idx: (B, N, K) -> (B, N, K, d)
    B, N, K = neigh_idx.shape
    idx = neigh_idx.reshape(B, N * K)
    g = jnp.take_along_axis(pc, idx[:, :, None], axis=1)
    return g.reshape(B, N, K, pc.shape[-1])


def relative_pos_encoding(xyz, neigh_idx):
    nxyz = gather_neighbour(xyz, neigh_idx)                       # (B,N,K,3)
    tile = jnp.broadcast_to(xyz[:, :, None, :], nxyz.shape)       # (B,N,K,3)
    rel = tile - nxyz
    dist = jnp.sqrt(jnp.sum(rel * rel, axis=-1, keepdims=True))   # (B,N,K,1)
    return jnp.concatenate([dist, rel, tile, nxyz], axis=-1)      # (B,N,K,10)


def block_forward_ref(feature_nchw, xyz, neigh_idx, params):
    feat = jnp.transpose(feature_nchw[..., 0], (0, 2, 1))         # (B, N, d_in)

    def conv_bn_relu(x, w, s, b):
        return jnp.maximum(x @ w * s + b, 0.0)

    f_xyz = relative_pos_encoding(xyz, neigh_idx)                           # (B,N,K,10)
    h1 = conv_bn_relu(f_xyz, params['w1'], params['s1'], params['b1'])      # mlp1
    f_pc = conv_bn_relu(feat, params['w2'], params['s2'], params['b2'])     # mlp2
    f_pc = gather_neighbour(f_pc, neigh_idx)                                # (B,N,K,dm)
    w3 = jnp.concatenate([params['w3a'], params['w3b']], axis=0)
    f_cat = jnp.concatenate([f_pc, h1], axis=-1)
    f_cat = conv_bn_relu(f_cat, w3, params['s3'], params['b3'])             # mlp3
    score = jnp.einsum('bnkd,k->bnd', f_cat, params['fcw'][0]) + params['fcb'][0, 0]
    score = jax.nn.softmax(score, axis=-1)
    f_max = jnp.max(f_cat, axis=2)
    f_agg = f_max + f_max * score
    h4 = conv_bn_relu(f_agg, params['w4'], params['s4'], params['b4'])      # mlp4
    sc = conv_bn_relu(feat, params['ws'], params['ss'], params['bs'])       # shortcut
    out = h4 + sc
    return jnp.transpose(out, (0, 2, 1))[..., None]


if __name__ == "__main__":
    key = jax.random.PRNGKey(0)
    B, N, K = 2, 256, 8          # batch, num points, k_n neighbours
    d_in, d_out, m = 8, 16, 2    # lfa_param m -> dm = d_out // m = 8

    k_feat, k_xyz, k_idx, k_par = jax.random.split(key, 4)
    feature = jax.random.normal(k_feat, (B, d_in, N, 1), jnp.float32)   # NCHW like PyTorch
    xyz = jax.random.normal(k_xyz, (B, N, 3), jnp.float32)
    neigh_idx = jax.random.randint(k_idx, (B, N, K), 0, N, jnp.int32)
    params = init_params(k_par, d_in, d_out, m, K)

    out = jax.block_until_ready(block_forward(feature, xyz, neigh_idx, params))
    ref = block_forward_ref(feature, xyz, neigh_idx, params)

    assert out.shape == (B, d_out, N, 1)
    assert bool(jnp.all(jnp.isfinite(out)))
    # Tolerance 1e-3 (was 1e-4): the softmax denominator now uses the EUP
    # approximate reciprocal (pl.reciprocal(approx=True)); all other math
    # matches the f32 reference to ~1e-6.
    assert bool(jnp.allclose(out, ref, atol=1e-3, rtol=1e-3)), float(
        jnp.max(jnp.abs(out - ref)))
    print("KERNEL_OK")
</pallas_src>

<mosaic_0001>
module attributes {stable_mosaic.version = 11 : i64} {
  func.func @_mlp2_kernel(%arg0: i32, %arg1: i32, %arg2: memref<1x8x128xf32, #tpu.memory_space<vmem>>, %arg3: memref<8x8xf32, #tpu.memory_space<vmem>>, %arg4: memref<8x1xf32, #tpu.memory_space<vmem>>, %arg5: memref<1x8x128xf32, #tpu.memory_space<vmem>>) attributes {dimension_semantics = [#tpu.dimension_semantics<parallel>, #tpu.dimension_semantics<parallel>], iteration_bounds = array<i64: 2, 2>, scalar_prefetch = 0 : i64, scratch_operands = 0 : i64, tpu.core_type = #tpu.core_type<tc>, window_params = [{transform_indices = @transform_0, window_bounds = array<i64: 1, 8, 128>}, {pipeline_mode = #tpu.pipeline_mode<synchronous>, transform_indices = @transform_1, window_bounds = array<i64: 8, 8>}, {pipeline_mode = #tpu.pipeline_mode<synchronous>, transform_indices = @transform_2, window_bounds = array<i64: 8, 1>}, {transform_indices = @transform_3, window_bounds = array<i64: 1, 8, 128>}]} {
    %c0 = arith.constant 0 : index
    %c0_0 = arith.constant 0 : index
    %c0_1 = arith.constant 0 : index
    %0 = vector.load %arg2[%c0, %c0_0, %c0_1] : memref<1x8x128xf32, #tpu.memory_space<vmem>>, vector<1x8x128xf32>
    %1 = vector.shape_cast %0 : vector<1x8x128xf32> to vector<8x128xf32>
    %c0_2 = arith.constant 0 : index
    %c0_3 = arith.constant 0 : index
    %2 = vector.load %arg3[%c0_2, %c0_3] : memref<8x8xf32, #tpu.memory_space<vmem>>, vector<8x8xf32>
    %cst = arith.constant dense<0.000000e+00> : vector<8x128xf32>
    %3 = tpu.matmul %2, %1, %cst {dimension_numbers = #tpu.dot_dimension_numbers<[1], [0], [0], [1], [0, 0, 1, 1], [], []>} : vector<8x8xf32>, vector<8x128xf32>, vector<8x128xf32> -> vector<8x128xf32>
    %c0_4 = arith.constant 0 : index
    %c0_5 = arith.constant 0 : index
    %4 = vector.load %arg4[%c0_4, %c0_5] : memref<8x1xf32, #tpu.memory_space<vmem>>, vector<8x1xf32>
    %5 = vector.broadcast %4 : vector<8x1xf32> to vector<8x128xf32>
    %6 = arith.addf %3, %5 : vector<8x128xf32>
    %cst_6 = arith.constant 0.000000e+00 : f32
    %7 = vector.broadcast %cst_6 : f32 to vector<8x128xf32>
    %8 = arith.maximumf %6, %7 : vector<8x128xf32>
    %c0_7 = arith.constant 0 : index
    %c0_8 = arith.constant 0 : index
    %c0_9 = arith.constant 0 : index
    %9 = vector.load %arg5[%c0_7, %c0_8, %c0_9] : memref<1x8x128xf32, #tpu.memory_space<vmem>>, vector<1x8x128xf32>
    %10 = vector.shape_cast %9 : vector<1x8x128xf32> to vector<8x128xf32>
    %11 = vector.shape_cast %8 : vector<8x128xf32> to vector<1x8x128xf32>
    tpu.vector_store %arg5[%c0_7, %c0_8, %c0_9], %11 {strides = array<i32>} : memref<1x8x128xf32, #tpu.memory_space<vmem>>, vector<1x8x128xf32>,
    return
  }
  func.func @transform_0(%arg0: i32, %arg1: i32) -> (i32, i32, i32) {
    %c0_i32 = arith.constant 0 : i32
    %c0_i32_0 = arith.constant 0 : i32
    return %arg0, %c0_i32, %arg1 : i32, i32, i32
  }
  func.func @transform_1(%arg0: i32, %arg1: i32) -> (i32, i32) {
    %c0_i32 = arith.constant 0 : i32
    %c0_i32_0 = arith.constant 0 : i32
    %c0_i32_1 = arith.constant 0 : i32
    return %c0_i32, %c0_i32_0 : i32, i32
  }
  func.func @transform_2(%arg0: i32, %arg1: i32) -> (i32, i32) {
    %c0_i32 = arith.constant 0 : i32
    %c0_i32_0 = arith.constant 0 : i32
    %c0_i32_1 = arith.constant 0 : i32
    return %c0_i32, %c0_i32_0 : i32, i32
  }
  func.func @transform_3(%arg0: i32, %arg1: i32) -> (i32, i32, i32) {
    %c0_i32 = arith.constant 0 : i32
    %c0_i32_0 = arith.constant 0 : i32
    return %arg0, %c0_i32, %arg1 : i32, i32, i32
  }
}

</mosaic_0001>

<bundles_post_ra>
// kernel: tpu_custom_call.1
= control target key start
LH: loop header
LB: loop body
LE: loop exit
PB: predicated region body
PF: predicated region fallthrough
CT: control target
= control target key end

     0   :  { %8 = vsyncpa [#allocation3], 0  ;;  %s738_s0 = inlined_call_operand.hbm [shape: f32[2,8,256], index: 0, kind: input, shape index: {}]   ;;  %s739_s1 = inlined_call_operand.vmem [shape: f32[8,8], index: 1, kind: input, shape index: {}]   ;;  %s740_s2 = inlined_call_operand.vmem [shape: f32[8,1], index: 2, kind: input, shape index: {}]   ;;  %s741_s3 = inlined_call_operand.hbm [shape: f32[2,8,256], index: 3, kind: output, shape index: {}]  }
   0x1   :  { %10 = vsyncpa [#allocation3 + $0x1], 0 }
   0x2   :  { %11 = vsyncpa [#allocation4], 0 }
   0x3   :  { %13 = vsyncpa [#allocation4 + $0x1], 0  ;;  %s590_s12 = smov 0   ;;  %s592_s13 = smov 0  }
   0x4   :  { %s594_s14 = smov 0   ;;  %s596_s15 = smov 0  }
   0x5   :  { %s598_s16 = smov 0   ;;  %s600_s17 = smov 0  }
   0x6   :  { %s602_s18 = smov 0   ;;  %s604_s19 = smov 0  }
   0x7 LB: > { %s343_s20 = sadd.s32 4294967295, %s567_s19   ;;  %s344_s21 = sadd.s32 4294967294, %s567_s19   ;;  %s567_s19 = sphi %s604_s19, %s19_s19   ;;  %s563_s18 = sphi %s602_s18, %s755_s18   ;;  %s559_s17 = sphi %s600_s17, %s754_s17   ;;  %s555_s16 = sphi %s598_s16, %s753_s16   ;;  %s551_s15 = sphi %s596_s15, %s752_s15   ;;  %s547_s14 = sphi %s594_s14, %s751_s14   ;;  %s543_s13 = sphi %s592_s13, %s750_s13   ;;  %s539_s12 = sphi %s590_s12, %s749_s12  }
   0x8   : > { %s28_s22 = sadd.s32 1, %s559_s17  ;;  %s31_s23 = sadd.s32 1, %s563_s18 }
   0x9   : > { %p29_p0 = scmp.ge.s32.totalorder %s28_s22, 2  ;;  %s40_s24 = sadd.s32 1, %s547_s14 }
   0xa   : > { %p47_p1 = scmp.ne.s32.totalorder %s547_s14, %s543_s13  ;;  %p48_p2 = scmp.eq.s32.totalorder %s567_s19, 0 }
   0xb   : > { %s757_s22 = smov (%p29_p0, %s28_s22), 0  ;;  %s759_s23 = smov (!%p29_p0, %s31_s23), %s563_s18 }
   0xc   : > { %s36_s25 = ssub.s32 %s559_s17, %s757_s22  ;;  %p643_p3 = por %p48_p2, %p47_p1 }
   0xd   : > { %p33_p4 = scmp.ge.s32.totalorder %s759_s23, 2  ;;  %p53_p5 = scmp.ne.s32.totalorder %s543_s13, %s539_s12 }
   0xe   : > { %p54_p6 = scmp.eq.s32.totalorder %s343_s20, 0  ;;  %p121_p7 = scmp.eq.s32.totalorder %s343_s20, 3 }
   0xf   : > { %s761_s23 = smov (%p33_p4, %s759_s23), 0  ;;  %p127_p10 = scmp.eq.s32.totalorder %s344_s21, 3 }
  0x10   : > { %744 = sst [smem:[#allocation8_spill]] %s761_s23  ;;  %p651_p8 = por %p54_p6, %p53_p5 }
  0x11   : > { %p655_p9 = por %p121_p7, %p47_p1  ;;  %s35_s29 = ssub.s32 %s563_s18, %s761_s23 }
  0x12   : > { %s37_s30 = sor.u32 %s36_s25, %s35_s29  ;;  %p661_p12 = por %p127_p10, %p53_p5 }
  0x13   : > { %p38_p11 = scmp.eq.s32.totalorder %s37_s30, 0  ;;  %p371_p13 = scmp.lt.s32.totalorder %s567_s19, 4 }
  0x14   : > { %s153_s5 = sand.u32 1, %s547_s14   ;;  %s348_s8 = sshll.u32 %s563_s18, 1 }
  0x15   : > { %s668_s6 = scalar_select %p38_p11, %s547_s14, %s40_s24  }
  0x16   : > { %s347_s7 = sshll.u32 %s153_s5, 3  ;;  %s161_s9 = sadd.s32 %s559_s17, %s348_s8 }
  0x17   : > { %s157_s10 = scalar_lea.vmem [#allocation2], %s347_s7  ;;  %s349_s20 = sshll.u32 %s161_s9, 3 }
  0x18   : > { %s167_s11 = sshll.u32 %s157_s10, 4  ;;  %s163_s29 = scalar_lea.hbm %s738_s0, %s349_s20  ;;  %s168_s11 = int_to_ptr.vmem [resolvable:$true] %s167_s11 }
  0x19   : > { %p364_p0 = pnand %p371_p13, %p643_p3  ;;  %s165_s30 = sshll.u32 %s163_s29, 4  ;;  %s166_s30 = int_to_ptr.hbm [resolvable:$true] %s165_s30 }
  0x1a   : > { %p350_p1 = scmp.ge.s32.totalorder %s567_s19, 1  ;;  %s154_s23 = scalar_lea.sflag [#allocation3], %s153_s5 }
  0x1b   : > { %366 = dma.hbm_to_vmem [thread:$0]  (!%p364_p0), %s166_s30, 128, %s168_s11, %s154_s23  }
  0x1c   : > { %p172_p2 = scmp.lt.s32.totalorder %s567_s19, 5 }
  0x1e   : > { %p173_p4 = pnand %p350_p1, %p172_p2 }
  0x1f   : > { %s680_s24 = sand.u32 (!%p173_p4), 1, %s543_s13  }
  0x20   : > { %176 = sbr.rel (%p173_p4) target bundleno = 173 (0xad), region = 32  ;;  %s351_s7 = sshll.u32 (!%p173_p4), %s680_s24, 3 }
  0x21   : > { %s179_s8 = scalar_lea.sflag (!%p173_p4), [#allocation3], %s680_s24  ;;  %s182_s9 = scalar_lea.vmem (!%p173_p4), [#allocation2], %s351_s7 }
  0x25   : > { %530 = dma.done.wait (%p651_p8), %s179_s8, 128  }
  0x26   : > { %532 = vsyncadd (%p651_p8), %s179_s8, 4294967168  ;;  %v569_v0 = vmov 0   ;;  %vm214_vm0 = vcmask 64512   ;;  %v206_v1 = vld [vmem:[%s182_s9] sm:$0xff]  ;;  %s355_s27 = sshll.u32 %s555_s16, 1  ;;  %s205_s30 = scalar_lea.vmem [#allocation5], %s351_s7 }
  0x27   : > { %438 = vset.pattern.permute.xlu0 %v569_v0  ;;  %v207_v2 = vld [vmem:[%s739_s1] sm:$0xff]  ;;  %233 = vmatpush.msra.mxu0 %v206_v1  ;;  %s251_s11 = sadd.s32 %s551_s15, %s355_s27  ;;  %s255_s8 = sshll.u32 %s205_s30, 4  ;;  %s256_s8 = int_to_ptr.vmem [resolvable:$true] %s255_s8 }
  0x28   : > { %v208_v3 = vld [vmem:[%s740_s2] sm:$0xff]  ;;  %353 = vmatmul.msk.f32.vlgmr.msra.gmra.mxu0 %vm214_vm0, %v207_v2  ;;  %s356_s20 = sshll.u32 %s251_s11, 3  ;;  %s241_s23 = scalar_lea.sflag [#allocation4], %s680_s24 }
  0x29   : > { %211 = vperm.xlu0 %438, %v208_v3   ;;  %s253_s29 = scalar_lea.hbm %s741_s3, %s356_s20  ;;  %s489_s10 = scalar_lea.hbm %s741_s3, 32 }
  0x2a   : > { %s257_s9 = sshll.u32 %s253_s29, 4  ;;  %s258_s9 = int_to_ptr.hbm [resolvable:$true] %s257_s9 }
  0x2b   : > { %s483_s26 = sshra.s32 %s258_s9, 4  ;;  %s484_s26 = int_to_ptr.hbm [resolvable:$true] %s483_s26 }
  0x2c   : > { %s485_s15 = scalar_lea.hbm %s484_s26, 8  ;;  %p490_p7 = scmp.lt.s32.totalorder %s484_s26, %s741_s3 }
  0x2d   : > { %p486_p3 = scmp.ne.s32.totalorder %s484_s26, %s485_s15  ;;  %p491_p8 = scmp.lt.s32.totalorder %s489_s10, %s485_s15 }
  0x2f   : > { %p487_p5 = pnand %p486_p3, %p655_p9  ;;  %p492_p10 = por %p491_p8, %p490_p7 }
  0x31   : > { %p488_p6 = pneg %p487_p5 }
  0x33   : > { %p493_p11 = pnand %p492_p10, %p488_p6 }
  0x9b   : > { %v212_v4 = vpop.permute.xlu0 %211 }
  0xa5   : > { %v235_v5 = vpop.f32.mrf.mxu0 }
  0xa6   : > { %v236_v6 = vadd.f32 %v235_v5, %v212_v4 }
  0xa8   : > { %v238_v7 = vmax.f32 %v236_v6, 0.0 }
  0xaa   : > { %239 = vst [vmem:[%s205_s30] sm:$0xff] %v238_v7 }
  0xab   : > { %496 = shalt.err (!%p493_p11)
}
  0xac   : > { %361 = dma.vmem_to_hbm [thread:$0]  (%p655_p9), %s256_s8, 128, %s258_s9, %s241_s23  }
  0xad PF: > { %p372_p13 = scmp.ge.s32.totalorder %s567_s19, 2  ;;  %s269_s24 = sand.u32 1, %s539_s12  }
  0xae   : > { %s270_s11 = scalar_lea.sflag [#allocation4], %s269_s24 }
  0xaf   : > { %p368_p0 = pnand %p372_p13, %p661_p12 }
  0xb1   : > { %p369_p1 = pneg %p368_p0 }
  0xb3   : > { %534 = dma.done.wait (%p369_p1), %s270_s11, 128  }
  0xb4   : > { %536 = vsyncadd (%p369_p1), %s270_s11, 4294967168  ;;  %s19_s19 = sadd.s32 1, %s567_s19   ;;  %s748_s28 = sld [smem:[#allocation8_spill]] }
  0xb5   : > { %p16_p2 = scmp.ge.s32.totalorder %s19_s19, 6   ;;  %s749_s12 = smov %s543_s13 }
  0xb6   : > { %s750_s13 = smov %s547_s14  ;;  %s751_s14 = smov %s668_s6 }
  0xb7   : > { %s752_s15 = smov %s559_s17  ;;  %s753_s16 = smov %s563_s18 }
  0xb8   : > { %s754_s17 = smov %s757_s22  ;;  %18 = sbr.rel (!%p16_p2) target bundleno = 7 (0x7), region = 77 }
  0xba   : > { %s755_s18 = smov %s748_s28 }
  0xbd   :  { %276 = vsyncpa [#allocation3], 1 }
  0xbe   :  { %278 = vsyncpa [#allocation3 + $0x1], 1 }
  0xbf   :  { %279 = vsyncpa [#allocation4], 1 }
  0xc0   :  { %281 = vsyncpa [#allocation4 + $0x1], 1 }

</bundles_post_ra>
